<compile_context>
chip_gen: v7x
topology: tpu7x:2x2x1
jax: 0.10.0
libtpu: 0.0.40
codegen_flags: <defaults>
</compile_context>

<pallas_src>
import jax
import jax.numpy as jnp
from jax.experimental import pallas as pl
from jax.experimental.pallas import tpu as pltpu


def _vmem_capacity_bytes():
    try:
        cap = getattr(pltpu.get_tpu_info(), "vmem_capacity_bytes", None)
        if cap:
            return int(cap)
    except Exception:
        pass
    return 64 * 1024 * 1024  # conservative default (v7x per-TensorCore)


def _conv_geometry(H, W, KH, KW, stride, padding, dilation):
    Hp, Wp = H + 2 * padding, W + 2 * padding
    Ho = (Hp - dilation * (KH - 1) - 1) // stride + 1
    Wo = (Wp - dilation * (KW - 1) - 1) // stride + 1
    return Hp, Wp, Ho, Wo


def _hblk(th, KH, stride, dilation):
    # Input rows consumed by `th` output rows (including the bottom halo).
    return (th - 1) * stride + (KH - 1) * dilation + 1


def _pick_row_tile(N, Ho, Wo, Wp, Cin, Cout, KH, KW, stride, dilation,
                   out_itemsize, budget_bytes):
    """Returns (TH, tiled).  tiled=False => one full-map block per batch."""
    halo = max((KH - 1) * dilation + 1 - stride, 0)

    def vmem_need(th, tiled):
        hb = _hblk(th, KH, stride, dilation)
        core = th * stride if tiled else hb
        hal = max(hb - core, 0) if tiled else 0
        m = th * Wo
        need = 2 * core * Wp * Cin * 2                 # input core block, x2 buffers
        need += 2 * hal * Wp * Cin * 2                 # halo block, x2 buffers
        need += 2 * Cout * m * out_itemsize            # output block, x2 buffers
        need += 2 * KH * KW * Cin * Cout * 2           # weights, x2 buffers
        need += (hb * Wp * Cin * 2) if hal else 0      # stitch-slab scratch
        need += 2 * m * Cout * 4                       # f32 accumulator live copies
        return need

    cands = []
    for th in range(1, Ho):
        if Ho % th:
            continue
        if (th * Wo) % 128:                            # lane-dense output block
            continue
        if halo and (th * stride) % halo:              # halo block must be addressable
            continue
        if vmem_need(th, True) > budget_bytes:
            continue
        cands.append(th)

    full_fits = vmem_need(Ho, False) <= budget_bytes
    if not cands:
        return Ho, False
    if N >= 2 and full_fits:
        # Batch axis already gives >= 2 parallel grid steps; take the biggest tile.
        return Ho, False
    # N == 1 (keep both v7x TensorCores busy) or full map too big for VMEM.
    return max(cands), True


def _make_kernel(*, KH, KW, Cin, TH, Wo, stride, dilation, core_rows, has_halo):
    """One grid step = one (batch element, output-row tile)."""
    M = TH * Wo

    def compute(x, w_ref, scale_ref, shift_ref, o_ref):
        # x:         (>=Hblk, Wp, Cin) bf16 input slab for this (batch, row tile)
        # w_ref:     (KH*KW, Cin, Cout) bf16 per-tap weights
        # scale_ref: (1, Cout) f32  folded BN scale  gamma / sqrt(var + eps)
        # shift_ref: (1, Cout) f32  folded BN shift  beta - mean * scale
        # o_ref:     (1, Cout, TH*Wo) output (NCHW, H*W flattened)
        acc = None
        for kh in range(KH):
            h0 = kh * dilation
            rows = x[h0:h0 + (TH - 1) * stride + 1:stride]            # (TH, Wp, Cin)
            for kw in range(KW):
                w0 = kw * dilation
                cols = rows[:, w0:w0 + (Wo - 1) * stride + 1:stride, :]  # (TH, Wo, Cin)
                lhs = cols.reshape(M, Cin)                                # (M, Cin)
                tap = jnp.dot(lhs, w_ref[kh * KW + kw],
                              preferred_element_type=jnp.float32)        # (M, Cout) f32
                acc = tap if acc is None else acc + tap

        # Module order is conv -> ReLU -> BatchNorm (eval); the BN affine must
        # stay on this side of the ReLU (scale may be negative).
        y = jnp.maximum(acc, 0.0)
        y = y * scale_ref[...] + shift_ref[...]                           # (M, Cout)
        # Cast before the transpose (halves XLU bytes for bf16 outputs), then
        # store lane-dense NCHW (Cout major, H*W flattened).
        o_ref[0] = y.astype(o_ref.dtype).T                                # (Cout, M)

    if has_halo:
        def kernel(xc_ref, xh_ref, w_ref, scale_ref, shift_ref, o_ref, slab_ref):
            # Stitch the non-overlapping core block and the tiny halo block into
            # one contiguous VMEM slab (single pass, outer-dim stores only).
            slab_ref[:core_rows] = xc_ref[0]
            slab_ref[core_rows:] = xh_ref[0]
            compute(slab_ref[...], w_ref, scale_ref, shift_ref, o_ref)
    else:
        def kernel(xc_ref, w_ref, scale_ref, shift_ref, o_ref):
            compute(xc_ref[0], w_ref, scale_ref, shift_ref, o_ref)

    return kernel


def basic_conv2d(x_nchw, w_oihw, gamma, beta, running_mean, running_var, *,
                 stride=1, padding=0, dilation=1, eps=1e-5,
                 row_tile=None, out_dtype=None):
    """Conv2d(bias=False) -> ReLU -> BatchNorm2d (eval mode). NCHW in / NCHW out."""
    N, Cin, H, W = x_nchw.shape
    Cout, Cin_w, KH, KW = w_oihw.shape
    assert Cin_w == Cin
    out_dtype = x_nchw.dtype if out_dtype is None else out_dtype
    out_itemsize = jnp.dtype(out_dtype).itemsize

    Hp, Wp, Ho, Wo = _conv_geometry(H, W, KH, KW, stride, padding, dilation)

    # Generation-aware VMEM budget (v7x: 64 MiB physical -> ~48 MiB limit;
    # v5e/v6e: 128 MiB physical -> 96 MiB limit).
    vmem_limit = min(_vmem_capacity_bytes() * 3 // 4, 96 * 1024 * 1024)
    budget = int(vmem_limit * 0.6)

    if row_tile is None:
        TH, tiled = _pick_row_tile(N, Ho, Wo, Wp, Cin, Cout, KH, KW, stride,
                                   dilation, out_itemsize, budget)
    else:
        TH = int(row_tile)
        tiled = TH < Ho
        assert Ho % TH == 0, f"row_tile={TH} must divide output height {Ho}"
        if tiled:
            assert (TH * Wo) % 128 == 0, \
                "row-tiled output block must be a multiple of 128 lanes"

    HT = Ho // TH
    Hblk = _hblk(TH, KH, stride, dilation)
    core_rows = TH * stride if tiled else Hblk
    halo_rows = max(Hblk - core_rows, 0)
    has_halo = tiled and halo_rows > 0
    if has_halo:
        assert core_rows % halo_rows == 0, (
            f"row_tile={TH}: core rows ({core_rows}) must be a multiple of the "
            f"halo ({halo_rows}) to express the overlapping window via BlockSpec")
        halo_step = core_rows // halo_rows
    M = TH * Wo
    K_taps = KH * KW

    # ---- wrapper glue (fused by XLA into a single layout pass) ---------------
    # NCHW -> NHWC bf16 (halves HBM->VMEM bytes; MXU runs bf16), spatial pad.
    x = jnp.transpose(x_nchw, (0, 2, 3, 1)).astype(jnp.bfloat16)
    x = jnp.pad(x, ((0, 0), (padding, padding), (padding, padding), (0, 0)))

    # Per-tap weights: (Cout, Cin, KH, KW) -> (KH*KW, Cin, Cout), bf16.
    w = (jnp.transpose(w_oihw, (2, 3, 1, 0))
         .reshape(K_taps, Cin, Cout).astype(jnp.bfloat16))

    # TODO(synk): BatchNorm uses eval-mode running statistics; training-mode
    # batch statistics are not implemented.
    inv = 1.0 / jnp.sqrt(running_var.astype(jnp.float32) + eps)
    scale = (gamma.astype(jnp.float32) * inv).reshape(1, Cout)
    shift = (beta.astype(jnp.float32)
             - running_mean.astype(jnp.float32) * gamma.astype(jnp.float32) * inv
             ).reshape(1, Cout)

    kernel = _make_kernel(KH=KH, KW=KW, Cin=Cin, TH=TH, Wo=Wo, stride=stride,
                          dilation=dilation, core_rows=core_rows,
                          has_halo=has_halo)

    # TODO(synk): the grid-invariant weight/scale/shift operands could be
    # single-buffered (pl.Buffered(1)) for extra VMEM headroom; their double
    # buffers are instead accounted for in the tile picker's byte model.
    in_specs = [pl.BlockSpec((1, core_rows, Wp, Cin), lambda n, t: (n, t, 0, 0))]
    operands = [x]
    if has_halo:
        in_specs.append(pl.BlockSpec(
            (1, halo_rows, Wp, Cin),
            lambda n, t: (n, (t + 1) * halo_step, 0, 0)))
        operands.append(x)  # same HBM buffer: overlapping-window (halo) view
    in_specs += [
        pl.BlockSpec((K_taps, Cin, Cout), lambda n, t: (0, 0, 0)),
        pl.BlockSpec((1, Cout), lambda n, t: (0, 0)),
        pl.BlockSpec((1, Cout), lambda n, t: (0, 0)),
    ]
    operands += [w, scale, shift]

    scratch_shapes = ([pltpu.VMEM((Hblk, Wp, Cin), jnp.bfloat16)]
                      if has_halo else [])

    out_flat = pl.pallas_call(
        kernel,
        out_shape=jax.ShapeDtypeStruct((N, Cout, Ho * Wo), out_dtype),
        grid_spec=pltpu.PrefetchScalarGridSpec(
            num_scalar_prefetch=0,
            grid=(N, HT),
            in_specs=in_specs,
            out_specs=pl.BlockSpec((1, Cout, M), lambda n, t: (n, 0, t)),
            scratch_shapes=scratch_shapes),
        compiler_params=pltpu.CompilerParams(
            dimension_semantics=("parallel", "parallel"),
            vmem_limit_bytes=int(vmem_limit)),
    )(*operands)

    # Free reshape: the kernel already emitted NCHW (Cout major, H*W flattened).
    return out_flat.reshape(N, Cout, Ho, Wo)


def _reference(x, w, gamma, beta, mean, var, *, stride, padding, dilation, eps=1e-5):
    # Match the kernel's numerics (bf16 operands, f32 accumulation).
    xb = x.astype(jnp.bfloat16).astype(jnp.float32)
    wb = w.astype(jnp.bfloat16).astype(jnp.float32)
    y = jax.lax.conv_general_dilated(
        xb, wb, window_strides=(stride, stride),
        padding=[(padding, padding), (padding, padding)],
        rhs_dilation=(dilation, dilation),
        dimension_numbers=("NCHW", "OIHW", "NCHW"))
    y = jnp.maximum(y, 0.0)
    g = gamma.reshape(1, -1, 1, 1)
    b = beta.reshape(1, -1, 1, 1)
    m = mean.reshape(1, -1, 1, 1)
    v = var.reshape(1, -1, 1, 1)
    return g * (y - m) / jnp.sqrt(v + eps) + b


if __name__ == "__main__":
    # BasicConv2d(in_planes=4, out_planes=8, kernel_size=3, stride=1, padding=1)
    N, Cin, H, W = 2, 4, 16, 16
    Cout, Ksz = 8, 3
    stride, padding, dilation = 1, 1, 1

    key = jax.random.PRNGKey(0)
    k1, k2, k3, k4, k5 = jax.random.split(key, 5)

    x = jax.random.normal(k1, (N, Cin, H, W), jnp.float32)
    w = jax.random.normal(k2, (Cout, Cin, Ksz, Ksz), jnp.float32) * 0.1
    gamma = 1.0 + 0.1 * jax.random.normal(k3, (Cout,), jnp.float32)
    beta = 0.1 * jax.random.normal(k4, (Cout,), jnp.float32)
    running_mean = 0.05 * jax.random.normal(k5, (Cout,), jnp.float32)
    running_var = jnp.ones((Cout,), jnp.float32)

    ref = _reference(x, w, gamma, beta, running_mean, running_var,
                     stride=stride, padding=padding, dilation=dilation)

    # 1) Forced row-tiled path: exercises the overlapping core+halo BlockSpec
    #    views (grid = 2 batches x 2 row tiles, output tile = 8*16 = 128 lanes).
    out_tiled = basic_conv2d(x, w, gamma, beta, running_mean, running_var,
                             stride=stride, padding=padding, dilation=dilation,
                             row_tile=8)
    out_tiled = jax.block_until_ready(out_tiled)
    assert out_tiled.shape == ref.shape == (N, Cout, H, W)
    err_t = float(jnp.max(jnp.abs(out_tiled - ref)))
    assert jnp.allclose(out_tiled, ref, atol=2e-3, rtol=2e-3), err_t

    # 2) Auto-picked tiling (full map per batch at these shapes, grid = (N, 1)).
    out_auto = basic_conv2d(x, w, gamma, beta, running_mean, running_var,
                            stride=stride, padding=padding, dilation=dilation)
    out_auto = jax.block_until_ready(out_auto)
    err_a = float(jnp.max(jnp.abs(out_auto - ref)))
    assert jnp.allclose(out_auto, ref, atol=2e-3, rtol=2e-3), err_a

    print("KERNEL_OK")
</pallas_src>

<mosaic_0001>
module attributes {stable_mosaic.version = 11 : i64} {
  func.func @kernel(%arg0: i32, %arg1: i32, %arg2: memref<1x8x18x4xbf16, #tpu.memory_space<vmem>>, %arg3: memref<1x2x18x4xbf16, #tpu.memory_space<vmem>>, %arg4: memref<9x4x8xbf16, #tpu.memory_space<vmem>>, %arg5: memref<1x8xf32, #tpu.memory_space<vmem>>, %arg6: memref<1x8xf32, #tpu.memory_space<vmem>>, %arg7: memref<1x8x128xf32, #tpu.memory_space<vmem>>, %arg8: memref<10x18x4xbf16, #tpu.memory_space<vmem>>) attributes {dimension_semantics = [#tpu.dimension_semantics<parallel>, #tpu.dimension_semantics<parallel>], iteration_bounds = array<i64: 2, 2>, scalar_prefetch = 0 : i64, scratch_operands = 1 : i64, tpu.core_type = #tpu.core_type<tc>, window_params = [{transform_indices = @transform_0, window_bounds = array<i64: 1, 8, 18, 4>}, {transform_indices = @transform_1, window_bounds = array<i64: 1, 2, 18, 4>}, {pipeline_mode = #tpu.pipeline_mode<synchronous>, transform_indices = @transform_2, window_bounds = array<i64: 9, 4, 8>}, {pipeline_mode = #tpu.pipeline_mode<synchronous>, transform_indices = @transform_3, window_bounds = array<i64: 1, 8>}, {pipeline_mode = #tpu.pipeline_mode<synchronous>, transform_indices = @transform_4, window_bounds = array<i64: 1, 8>}, {transform_indices = @transform_5, window_bounds = array<i64: 1, 8, 128>}]} {
    %c0 = arith.constant 0 : index
    %c0_0 = arith.constant 0 : index
    %c0_1 = arith.constant 0 : index
    %c0_2 = arith.constant 0 : index
    %0 = vector.load %arg2[%c0, %c0_0, %c0_1, %c0_2] : memref<1x8x18x4xbf16, #tpu.memory_space<vmem>>, vector<1x8x18x4xbf16>
    %1 = vector.shape_cast %0 : vector<1x8x18x4xbf16> to vector<8x18x4xbf16>
    %c0_3 = arith.constant 0 : index
    %c0_4 = arith.constant 0 : index
    %c0_5 = arith.constant 0 : index
    %2 = vector.load %arg8[%c0_3, %c0_4, %c0_5] : memref<10x18x4xbf16, #tpu.memory_space<vmem>>, vector<8x18x4xbf16>
    tpu.vector_store %arg8[%c0_3, %c0_4, %c0_5], %1 {strides = array<i32>} : memref<10x18x4xbf16, #tpu.memory_space<vmem>>, vector<8x18x4xbf16>,
    %c0_6 = arith.constant 0 : index
    %c0_7 = arith.constant 0 : index
    %c0_8 = arith.constant 0 : index
    %c0_9 = arith.constant 0 : index
    %3 = vector.load %arg3[%c0_6, %c0_7, %c0_8, %c0_9] : memref<1x2x18x4xbf16, #tpu.memory_space<vmem>>, vector<1x2x18x4xbf16>
    %4 = vector.shape_cast %3 : vector<1x2x18x4xbf16> to vector<2x18x4xbf16>
    %c8 = arith.constant 8 : index
    %c0_10 = arith.constant 0 : index
    %c0_11 = arith.constant 0 : index
    %5 = vector.load %arg8[%c8, %c0_10, %c0_11] : memref<10x18x4xbf16, #tpu.memory_space<vmem>>, vector<2x18x4xbf16>
    tpu.vector_store %arg8[%c8, %c0_10, %c0_11], %4 {strides = array<i32>} : memref<10x18x4xbf16, #tpu.memory_space<vmem>>, vector<2x18x4xbf16>,
    %c0_12 = arith.constant 0 : index
    %c0_13 = arith.constant 0 : index
    %c0_14 = arith.constant 0 : index
    %6 = vector.load %arg8[%c0_12, %c0_13, %c0_14] : memref<10x18x4xbf16, #tpu.memory_space<vmem>>, vector<10x18x4xbf16>
    %7 = vector.extract_strided_slice %6 {offsets = [0, 0, 0], sizes = [8, 18, 4], strides = [1, 1, 1]} : vector<10x18x4xbf16> to vector<8x18x4xbf16>
    %8 = vector.extract_strided_slice %7 {offsets = [0, 0, 0], sizes = [8, 16, 4], strides = [1, 1, 1]} : vector<8x18x4xbf16> to vector<8x16x4xbf16>
    %9 = vector.shape_cast %8 : vector<8x16x4xbf16> to vector<128x4xbf16>
    %c0_15 = arith.constant 0 : index
    %c0_16 = arith.constant 0 : index
    %c0_17 = arith.constant 0 : index
    %10 = vector.load %arg4[%c0_15, %c0_16, %c0_17] : memref<9x4x8xbf16, #tpu.memory_space<vmem>>, vector<1x4x8xbf16>
    %11 = vector.shape_cast %10 : vector<1x4x8xbf16> to vector<4x8xbf16>
    %cst = arith.constant dense<0.000000e+00> : vector<128x8xf32>
    %12 = tpu.matmul %9, %11, %cst {dimension_numbers = #tpu.dot_dimension_numbers<[1], [0], [0], [1], [0, 0, 1, 1], [], []>} : vector<128x4xbf16>, vector<4x8xbf16>, vector<128x8xf32> -> vector<128x8xf32>
    %13 = vector.extract_strided_slice %7 {offsets = [0, 1, 0], sizes = [8, 16, 4], strides = [1, 1, 1]} : vector<8x18x4xbf16> to vector<8x16x4xbf16>
    %14 = vector.shape_cast %13 : vector<8x16x4xbf16> to vector<128x4xbf16>
    %c1 = arith.constant 1 : index
    %c0_18 = arith.constant 0 : index
    %c0_19 = arith.constant 0 : index
    %15 = vector.load %arg4[%c1, %c0_18, %c0_19] : memref<9x4x8xbf16, #tpu.memory_space<vmem>>, vector<1x4x8xbf16>
    %16 = vector.shape_cast %15 : vector<1x4x8xbf16> to vector<4x8xbf16>
    %cst_20 = arith.constant dense<0.000000e+00> : vector<128x8xf32>
    %17 = tpu.matmul %14, %16, %cst_20 {dimension_numbers = #tpu.dot_dimension_numbers<[1], [0], [0], [1], [0, 0, 1, 1], [], []>} : vector<128x4xbf16>, vector<4x8xbf16>, vector<128x8xf32> -> vector<128x8xf32>
    %18 = arith.addf %12, %17 : vector<128x8xf32>
    %19 = vector.extract_strided_slice %7 {offsets = [0, 2, 0], sizes = [8, 16, 4], strides = [1, 1, 1]} : vector<8x18x4xbf16> to vector<8x16x4xbf16>
    %20 = vector.shape_cast %19 : vector<8x16x4xbf16> to vector<128x4xbf16>
    %c2 = arith.constant 2 : index
    %c0_21 = arith.constant 0 : index
    %c0_22 = arith.constant 0 : index
    %21 = vector.load %arg4[%c2, %c0_21, %c0_22] : memref<9x4x8xbf16, #tpu.memory_space<vmem>>, vector<1x4x8xbf16>
    %22 = vector.shape_cast %21 : vector<1x4x8xbf16> to vector<4x8xbf16>
    %cst_23 = arith.constant dense<0.000000e+00> : vector<128x8xf32>
    %23 = tpu.matmul %20, %22, %cst_23 {dimension_numbers = #tpu.dot_dimension_numbers<[1], [0], [0], [1], [0, 0, 1, 1], [], []>} : vector<128x4xbf16>, vector<4x8xbf16>, vector<128x8xf32> -> vector<128x8xf32>
    %24 = arith.addf %18, %23 : vector<128x8xf32>
    %25 = vector.extract_strided_slice %6 {offsets = [1, 0, 0], sizes = [8, 18, 4], strides = [1, 1, 1]} : vector<10x18x4xbf16> to vector<8x18x4xbf16>
    %26 = vector.extract_strided_slice %25 {offsets = [0, 0, 0], sizes = [8, 16, 4], strides = [1, 1, 1]} : vector<8x18x4xbf16> to vector<8x16x4xbf16>
    %27 = vector.shape_cast %26 : vector<8x16x4xbf16> to vector<128x4xbf16>
    %c3 = arith.constant 3 : index
    %c0_24 = arith.constant 0 : index
    %c0_25 = arith.constant 0 : index
    %28 = vector.load %arg4[%c3, %c0_24, %c0_25] : memref<9x4x8xbf16, #tpu.memory_space<vmem>>, vector<1x4x8xbf16>
    %29 = vector.shape_cast %28 : vector<1x4x8xbf16> to vector<4x8xbf16>
    %cst_26 = arith.constant dense<0.000000e+00> : vector<128x8xf32>
    %30 = tpu.matmul %27, %29, %cst_26 {dimension_numbers = #tpu.dot_dimension_numbers<[1], [0], [0], [1], [0, 0, 1, 1], [], []>} : vector<128x4xbf16>, vector<4x8xbf16>, vector<128x8xf32> -> vector<128x8xf32>
    %31 = arith.addf %24, %30 : vector<128x8xf32>
    %32 = vector.extract_strided_slice %25 {offsets = [0, 1, 0], sizes = [8, 16, 4], strides = [1, 1, 1]} : vector<8x18x4xbf16> to vector<8x16x4xbf16>
    %33 = vector.shape_cast %32 : vector<8x16x4xbf16> to vector<128x4xbf16>
    %c4 = arith.constant 4 : index
    %c0_27 = arith.constant 0 : index
    %c0_28 = arith.constant 0 : index
    %34 = vector.load %arg4[%c4, %c0_27, %c0_28] : memref<9x4x8xbf16, #tpu.memory_space<vmem>>, vector<1x4x8xbf16>
    %35 = vector.shape_cast %34 : vector<1x4x8xbf16> to vector<4x8xbf16>
    %cst_29 = arith.constant dense<0.000000e+00> : vector<128x8xf32>
    %36 = tpu.matmul %33, %35, %cst_29 {dimension_numbers = #tpu.dot_dimension_numbers<[1], [0], [0], [1], [0, 0, 1, 1], [], []>} : vector<128x4xbf16>, vector<4x8xbf16>, vector<128x8xf32> -> vector<128x8xf32>
    %37 = arith.addf %31, %36 : vector<128x8xf32>
    %38 = vector.extract_strided_slice %25 {offsets = [0, 2, 0], sizes = [8, 16, 4], strides = [1, 1, 1]} : vector<8x18x4xbf16> to vector<8x16x4xbf16>
    %39 = vector.shape_cast %38 : vector<8x16x4xbf16> to vector<128x4xbf16>
    %c5 = arith.constant 5 : index
    %c0_30 = arith.constant 0 : index
    %c0_31 = arith.constant 0 : index
    %40 = vector.load %arg4[%c5, %c0_30, %c0_31] : memref<9x4x8xbf16, #tpu.memory_space<vmem>>, vector<1x4x8xbf16>
    %41 = vector.shape_cast %40 : vector<1x4x8xbf16> to vector<4x8xbf16>
    %cst_32 = arith.constant dense<0.000000e+00> : vector<128x8xf32>
    %42 = tpu.matmul %39, %41, %cst_32 {dimension_numbers = #tpu.dot_dimension_numbers<[1], [0], [0], [1], [0, 0, 1, 1], [], []>} : vector<128x4xbf16>, vector<4x8xbf16>, vector<128x8xf32> -> vector<128x8xf32>
    %43 = arith.addf %37, %42 : vector<128x8xf32>
    %44 = vector.extract_strided_slice %6 {offsets = [2, 0, 0], sizes = [8, 18, 4], strides = [1, 1, 1]} : vector<10x18x4xbf16> to vector<8x18x4xbf16>
    %45 = vector.extract_strided_slice %44 {offsets = [0, 0, 0], sizes = [8, 16, 4], strides = [1, 1, 1]} : vector<8x18x4xbf16> to vector<8x16x4xbf16>
    %46 = vector.shape_cast %45 : vector<8x16x4xbf16> to vector<128x4xbf16>
    %c6 = arith.constant 6 : index
    %c0_33 = arith.constant 0 : index
    %c0_34 = arith.constant 0 : index
    %47 = vector.load %arg4[%c6, %c0_33, %c0_34] : memref<9x4x8xbf16, #tpu.memory_space<vmem>>, vector<1x4x8xbf16>
    %48 = vector.shape_cast %47 : vector<1x4x8xbf16> to vector<4x8xbf16>
    %cst_35 = arith.constant dense<0.000000e+00> : vector<128x8xf32>
    %49 = tpu.matmul %46, %48, %cst_35 {dimension_numbers = #tpu.dot_dimension_numbers<[1], [0], [0], [1], [0, 0, 1, 1], [], []>} : vector<128x4xbf16>, vector<4x8xbf16>, vector<128x8xf32> -> vector<128x8xf32>
    %50 = arith.addf %43, %49 : vector<128x8xf32>
    %51 = vector.extract_strided_slice %44 {offsets = [0, 1, 0], sizes = [8, 16, 4], strides = [1, 1, 1]} : vector<8x18x4xbf16> to vector<8x16x4xbf16>
    %52 = vector.shape_cast %51 : vector<8x16x4xbf16> to vector<128x4xbf16>
    %c7 = arith.constant 7 : index
    %c0_36 = arith.constant 0 : index
    %c0_37 = arith.constant 0 : index
    %53 = vector.load %arg4[%c7, %c0_36, %c0_37] : memref<9x4x8xbf16, #tpu.memory_space<vmem>>, vector<1x4x8xbf16>
    %54 = vector.shape_cast %53 : vector<1x4x8xbf16> to vector<4x8xbf16>
    %cst_38 = arith.constant dense<0.000000e+00> : vector<128x8xf32>
    %55 = tpu.matmul %52, %54, %cst_38 {dimension_numbers = #tpu.dot_dimension_numbers<[1], [0], [0], [1], [0, 0, 1, 1], [], []>} : vector<128x4xbf16>, vector<4x8xbf16>, vector<128x8xf32> -> vector<128x8xf32>
    %56 = arith.addf %50, %55 : vector<128x8xf32>
    %57 = vector.extract_strided_slice %44 {offsets = [0, 2, 0], sizes = [8, 16, 4], strides = [1, 1, 1]} : vector<8x18x4xbf16> to vector<8x16x4xbf16>
    %58 = vector.shape_cast %57 : vector<8x16x4xbf16> to vector<128x4xbf16>
    %c8_39 = arith.constant 8 : index
    %c0_40 = arith.constant 0 : index
    %c0_41 = arith.constant 0 : index
    %59 = vector.load %arg4[%c8_39, %c0_40, %c0_41] : memref<9x4x8xbf16, #tpu.memory_space<vmem>>, vector<1x4x8xbf16>
    %60 = vector.shape_cast %59 : vector<1x4x8xbf16> to vector<4x8xbf16>
    %cst_42 = arith.constant dense<0.000000e+00> : vector<128x8xf32>
    %61 = tpu.matmul %58, %60, %cst_42 {dimension_numbers = #tpu.dot_dimension_numbers<[1], [0], [0], [1], [0, 0, 1, 1], [], []>} : vector<128x4xbf16>, vector<4x8xbf16>, vector<128x8xf32> -> vector<128x8xf32>
    %62 = arith.addf %56, %61 : vector<128x8xf32>
    %cst_43 = arith.constant 0.000000e+00 : f32
    %63 = vector.broadcast %cst_43 : f32 to vector<128x8xf32>
    %64 = arith.maximumf %62, %63 : vector<128x8xf32>
    %c0_44 = arith.constant 0 : index
    %c0_45 = arith.constant 0 : index
    %65 = vector.load %arg5[%c0_44, %c0_45] : memref<1x8xf32, #tpu.memory_space<vmem>>, vector<1x8xf32>
    %66 = vector.broadcast %65 : vector<1x8xf32> to vector<128x8xf32>
    %67 = arith.mulf %64, %66 : vector<128x8xf32>
    %c0_46 = arith.constant 0 : index
    %c0_47 = arith.constant 0 : index
    %68 = vector.load %arg6[%c0_46, %c0_47] : memref<1x8xf32, #tpu.memory_space<vmem>>, vector<1x8xf32>
    %69 = vector.broadcast %68 : vector<1x8xf32> to vector<128x8xf32>
    %70 = arith.addf %67, %69 : vector<128x8xf32>
    %71 = tpu.transpose %70, [1, 0] : vector<128x8xf32> -> vector<8x128xf32>
    %c0_48 = arith.constant 0 : index
    %c0_49 = arith.constant 0 : index
    %c0_50 = arith.constant 0 : index
    %72 = vector.load %arg7[%c0_48, %c0_49, %c0_50] : memref<1x8x128xf32, #tpu.memory_space<vmem>>, vector<1x8x128xf32>
    %73 = vector.shape_cast %72 : vector<1x8x128xf32> to vector<8x128xf32>
    %74 = vector.shape_cast %71 : vector<8x128xf32> to vector<1x8x128xf32>
    tpu.vector_store %arg7[%c0_48, %c0_49, %c0_50], %74 {strides = array<i32>} : memref<1x8x128xf32, #tpu.memory_space<vmem>>, vector<1x8x128xf32>,
    return
  }
  func.func @transform_0(%arg0: i32, %arg1: i32) -> (i32, i32, i32, i32) {
    %c0_i32 = arith.constant 0 : i32
    %c0_i32_0 = arith.constant 0 : i32
    %c0_i32_1 = arith.constant 0 : i32
    return %arg0, %arg1, %c0_i32, %c0_i32_0 : i32, i32, i32, i32
  }
  func.func @transform_1(%arg0: i32, %arg1: i32) -> (i32, i32, i32, i32) {
    %c1_i32 = arith.constant 1 : i32
    %0 = arith.addi %arg1, %c1_i32 : i32
    %c4_i32 = arith.constant 4 : i32
    %1 = arith.muli %0, %c4_i32 : i32
    %c0_i32 = arith.constant 0 : i32
    %c0_i32_0 = arith.constant 0 : i32
    %c0_i32_1 = arith.constant 0 : i32
    return %arg0, %1, %c0_i32, %c0_i32_0 : i32, i32, i32, i32
  }
  func.func @transform_2(%arg0: i32, %arg1: i32) -> (i32, i32, i32) {
    %c0_i32 = arith.constant 0 : i32
    %c0_i32_0 = arith.constant 0 : i32
    %c0_i32_1 = arith.constant 0 : i32
    %c0_i32_2 = arith.constant 0 : i32
    return %c0_i32, %c0_i32_0, %c0_i32_1 : i32, i32, i32
  }
  func.func @transform_3(%arg0: i32, %arg1: i32) -> (i32, i32) {
    %c0_i32 = arith.constant 0 : i32
    %c0_i32_0 = arith.constant 0 : i32
    %c0_i32_1 = arith.constant 0 : i32
    return %c0_i32, %c0_i32_0 : i32, i32
  }
  func.func @transform_4(%arg0: i32, %arg1: i32) -> (i32, i32) {
    %c0_i32 = arith.constant 0 : i32
    %c0_i32_0 = arith.constant 0 : i32
    %c0_i32_1 = arith.constant 0 : i32
    return %c0_i32, %c0_i32_0 : i32, i32
  }
  func.func @transform_5(%arg0: i32, %arg1: i32) -> (i32, i32, i32) {
    %c0_i32 = arith.constant 0 : i32
    %c0_i32_0 = arith.constant 0 : i32
    return %arg0, %c0_i32, %arg1 : i32, i32, i32
  }
}

</mosaic_0001>

<bundles_post_ra>
// kernel: tpu_custom_call.1
= control target key start
LH: loop header
LB: loop body
LE: loop exit
PB: predicated region body
PF: predicated region fallthrough
CT: control target
= control target key end

     0   :  { %10 = vsyncpa [#allocation4], 0  ;;  %s3714_s0 = inlined_call_operand.vmem [shape: bf16[2,18,18,4], index: 0, kind: input, shape index: {}]   ;;  %s3715_s1 = inlined_call_operand.vmem [shape: bf16[2,18,18,4], index: 1, kind: input, shape index: {}]   ;;  %s3716_s2 = inlined_call_operand.vmem [shape: bf16[9,4,8], index: 2, kind: input, shape index: {}]   ;;  %s3717_s3 = inlined_call_operand.vmem [shape: f32[1,8], index: 3, kind: input, shape index: {}]   ;;  %s3718_s4 = inlined_call_operand.vmem [shape: f32[1,8], index: 4, kind: input, shape index: {}]   ;;  %s3719_s5 = inlined_call_operand.hbm [shape: f32[2,8,256], index: 5, kind: output, shape index: {}]  }
   0x1   :  { %12 = vsyncpa [#allocation4 + $0x1], 0  ;;  %s2934_s18 = smov 0   ;;  %s2936_s19 = smov 0  }
   0x2   :  { %s2938_s20 = smov 0   ;;  %s2940_s21 = smov 0  }
   0x3   :  { %s2942_s22 = smov 0   ;;  %s2944_s23 = smov 0  }
   0x4   :  { %s2946_s24 = smov 0   ;;  %s2948_s25 = smov 0  }
   0x5 LB: > { %s2198_s26 = sadd.s32 4294967295, %s2901_s25   ;;  %s2199_s27 = sadd.s32 4294967294, %s2901_s25   ;;  %s2901_s25 = sphi %s2948_s25, %s18_s25   ;;  %s2897_s24 = sphi %s2946_s24, %s3733_s24   ;;  %s2893_s23 = sphi %s2944_s23, %s3732_s23   ;;  %s2889_s22 = sphi %s2942_s22, %s3731_s22   ;;  %s2885_s21 = sphi %s2940_s21, %s3730_s21   ;;  %s2881_s20 = sphi %s2938_s20, %s3729_s20   ;;  %s2877_s19 = sphi %s2936_s19, %s3728_s19   ;;  %s2873_s18 = sphi %s2934_s18, %s3727_s18  }
   0x6   : > { %s27_s28 = sadd.s32 1, %s2893_s23  ;;  %s30_s29 = sadd.s32 1, %s2897_s24 }
   0x7   : > { %p28_p0 = scmp.ge.s32.totalorder %s27_s28, 2  ;;  %p172_p1 = scmp.ne.s32.totalorder %s2881_s20, %s2877_s19 }
   0x8   : > { %p173_p2 = scmp.eq.s32.totalorder %s2198_s26, 3  ;;  %p178_p5 = scmp.ne.s32.totalorder %s2877_s19, %s2873_s18 }
   0x9   : > { %s3735_s28 = smov (%p28_p0, %s27_s28), 0  ;;  %s3737_s29 = smov (!%p28_p0, %s30_s29), %s2897_s24 }
   0xa   : > { %s158_s30 = ssub.s32 %s2893_s23, %s3735_s28  ;;  %p2985_p3 = por %p173_p2, %p172_p1 }
   0xb   : > { %p32_p4 = scmp.ge.s32.totalorder %s3737_s29, 2  ;;  %p179_p6 = scmp.eq.s32.totalorder %s2199_s27, 3 }
   0xc   : > { %p2204_p7 = scmp.ge.s32.totalorder %s2901_s25, 1  ;;  %p248_p9 = scmp.lt.s32.totalorder %s2901_s25, 5 }
   0xd   : > { %s3739_s29 = smov (%p32_p4, %s3737_s29), 0  ;;  %p2994_p8 = por %p179_p6, %p178_p5 }
   0xe   : > { %s157_s8 = ssub.s32 %s2897_s24, %s3739_s29  ;;  %s162_s9 = sadd.s32 1, %s2881_s20 }
   0xf   : > { %s159_s10 = sor.u32 %s158_s30, %s157_s8  ;;  %p249_p10 = pnand %p2204_p7, %p248_p9 }
  0x10   : > { %p160_p11 = scmp.eq.s32.totalorder %s159_s10, 0  ;;  %vm675_vm0 = vcmask (!%p249_p10), 1041408   ;;  %v3008_v0 = vld [vmem:[%s3716_s2 + $0x8] sm:$0x3] (!%p249_p10)  ;;  %v2211_v1 = vld [vmem:[%s3716_s2 + $0x2] sm:$0x3] (!%p249_p10) }
  0x11   : > { %252 = sbr.rel (%p249_p10) target bundleno = 546 (0x222), region = 40  ;;  %s3014_s16 = sshll.u32 (!%p249_p10), %s2885_s21, 3  ;;  %2724 = vmatprep.subr.msk.bf16.mxu0 (!%p249_p10), %vm675_vm0, %v3008_v0  ;;  %2720 = vmatprep.subr.msk.bf16.mxu1 (!%p249_p10), %vm675_vm0, %v2211_v1  ;;  %v3021_v2 = vsel (!%p249_p10), %vm675_vm0, %v3008_v0, 0  ;;  %v677_v3 = vsel (!%p249_p10), %vm675_vm0, %v2211_v1, 0  ;;  %v2290_v4 = vld [vmem:[%s3716_s2 + $0xa] sm:$0x3] (!%p249_p10) }
  0x12   : > { %s3003_s11 = scalar_select %p160_p11, %s2881_s20, %s162_s9  }
  0x13   : > { %p304_p12 = scmp.lt.s32.totalorder (!%p249_p10), %s2889_s22, 1  ;;  %p306_p13 = scmp.lt.s32.totalorder (!%p249_p10), %s3014_s16, 17  ;;  %2501 = vmatpush3.bf16.msra.mxu0 (!%p249_p10), %v3021_v2  ;;  %2429 = vmatpush3.bf16.msra.mxu1 (!%p249_p10), %v677_v3  ;;  %v428_v5 = vld [vmem:[%s3716_s2] sm:$0x3] (!%p249_p10)  ;;  %v3043_v6 = vld [vmem:[%s3716_s2 + $0xc] sm:$0x3] (!%p249_p10) }
  0x14   : > { %2726 = vmatprep.subr.msk.bf16.mxu0 (!%p249_p10), %vm675_vm0, %v2290_v4  ;;  %2721 = vmatprep.subr.msk.bf16.mxu1 (!%p249_p10), %vm675_vm0, %v428_v5  ;;  %vm359_vm1 = vcmask (!%p249_p10), 27648   ;;  %vm362_vm2 = vcmask (!%p249_p10), 24576   ;;  %v3053_v7 = vsel (!%p249_p10), %vm675_vm0, %v2290_v4, 0  ;;  %v3056_v8 = vsel (!%p249_p10), %vm675_vm0, %v428_v5, 0  ;;  %s2334_s30 = sshll.u32 (!%p249_p10), %s2889_s22, 1 }
  0x15   : > { %v3060_v9 = vsel (!%p249_p10), %vm675_vm0, %v3043_v6, 0  ;;  %vm429_vm3 = vsmask.f32 (!%p249_p10), 3328  ;;  %vm430_vm4 = vsmask.f32 (!%p249_p10), 7440  ;;  %vm650_vm5 = vcmask (!%p249_p10), 31744  }
  0x16   : > { %vm3143_vm6 = vmor (!%p249_p10), %vm429_vm3, %vm430_vm4  ;;  %vm948_vm7 = vcmask (!%p249_p10), 1042432   ;;  %vm949_vm8 = vcmask (!%p249_p10), 1046532  }
  0x17   : > { %vm3233_vm9 = vmor (!%p249_p10), %vm948_vm7, %vm949_vm8 }
  0x18   : > { %s3028_s17 = scalar_select %p304_p12, %s2889_s22, 1 }
  0x19   : > { %s307_s9 = scalar_select %p306_p13, %s3014_s16, 17 }
  0x1a   : > { %s2731_s10 = smul.u32 54, %s3028_s17 }
  0x1b   : > { %s2730_s12 = smul.u32 3, %s307_s9  ;;  %s2346_s9 = sadd.s32 8, %s3014_s16 }
  0x1c   : > { %p3130_p0 = scmp.lt.s32.totalorder %s2346_s9, 17 }
  0x1d   : > { %s310_s15 = sadd.s32 %s2731_s10, %s2730_s12 }
  0x1e   : > { %s2207_s26 = sshll.u32 %s310_s15, 2  ;;  %s3741_s9 = smov (!%p3130_p0, %s2346_s9), 17 }
  0x1f   : > { %s3050_s8 = scalar_lea.vmem %s3714_s0, %s2207_s26  ;;  %s2732_s13 = smul.u32 3, %s3741_s9 }
  0x20   : > { %v335_v10 = vld [vmem:[%s3050_s8] sm:$0xf]  ;;  %v336_v11 = vld [vmem:[%s3050_s8 + $0x4] sm:$0xf]  ;;  %v337_v12 = vld [vmem:[%s3050_s8 + $0x8] sm:$0x1] }
  0x21   : > { %360 = vst.msk [vmem:[#allocation2] sm:$0xf] %vm359_vm1, %v335_v10  ;;  %361 = vst.msk [vmem:[#allocation2 + $0x4] sm:$0xf] %vm359_vm1, %v336_v11  ;;  %v338_v13 = vld [vmem:[%s3050_s8 + $0xc] sm:$0xf]  ;;  %s3167_s16 = sadd.s32 %s2732_s13, %s2731_s10 }
  0x22   : > { %363 = vst.msk [vmem:[#allocation2 + $0x8] sm:$0x1] %vm362_vm2, %v337_v12  ;;  %v339_v14 = vld [vmem:[%s3050_s8 + $0x10] sm:$0xf]  ;;  %v340_v15 = vld [vmem:[%s3050_s8 + $0x14] sm:$0x1] }
  0x23   : > { %364 = vst.msk [vmem:[#allocation2 + $0xc] sm:$0xf] %vm359_vm1, %v338_v13  ;;  %365 = vst.msk [vmem:[#allocation2 + $0x10] sm:$0xf] %vm359_vm1, %v339_v14  ;;  %v341_v16 = vld [vmem:[%s3050_s8 + $0x18] sm:$0xf] }
  0x24   : > { %366 = vst.msk [vmem:[#allocation2 + $0x14] sm:$0x1] %vm362_vm2, %v340_v15  ;;  %v342_v17 = vld [vmem:[%s3050_s8 + $0x1c] sm:$0xf]  ;;  %v343_v18 = vld [vmem:[%s3050_s8 + $0x20] sm:$0x1] }
  0x25   : > { %367 = vst.msk [vmem:[#allocation2 + $0x18] sm:$0xf] %vm359_vm1, %v341_v16  ;;  %368 = vst.msk [vmem:[#allocation2 + $0x1c] sm:$0xf] %vm359_vm1, %v342_v17  ;;  %v344_v19 = vld [vmem:[%s3050_s8 + $0x24] sm:$0xf] }
  0x26   : > { %369 = vst.msk [vmem:[#allocation2 + $0x20] sm:$0x1] %vm362_vm2, %v343_v18  ;;  %v345_v20 = vld [vmem:[%s3050_s8 + $0x28] sm:$0xf]  ;;  %v346_v21 = vld [vmem:[%s3050_s8 + $0x2c] sm:$0x1] }
  0x27   : > { %370 = vst.msk [vmem:[#allocation2 + $0x24] sm:$0xf] %vm359_vm1, %v344_v19  ;;  %371 = vst.msk [vmem:[#allocation2 + $0x28] sm:$0xf] %vm359_vm1, %v345_v20  ;;  %v347_v22 = vld [vmem:[%s3050_s8 + $0x30] sm:$0xf] }
  0x28   : > { %372 = vst.msk [vmem:[#allocation2 + $0x2c] sm:$0x1] %vm362_vm2, %v346_v21  ;;  %v348_v23 = vld [vmem:[%s3050_s8 + $0x34] sm:$0xf]  ;;  %v349_v24 = vld [vmem:[%s3050_s8 + $0x38] sm:$0x1] }
  0x29   : > { %373 = vst.msk [vmem:[#allocation2 + $0x30] sm:$0xf] %vm359_vm1, %v347_v22  ;;  %374 = vst.msk [vmem:[#allocation2 + $0x34] sm:$0xf] %vm359_vm1, %v348_v23  ;;  %v350_v25 = vld [vmem:[%s3050_s8 + $0x3c] sm:$0xf] }
  0x2a   : > { %375 = vst.msk [vmem:[#allocation2 + $0x38] sm:$0x1] %vm362_vm2, %v349_v24  ;;  %v351_v26 = vld [vmem:[%s3050_s8 + $0x40] sm:$0xf]  ;;  %v352_v27 = vld [vmem:[%s3050_s8 + $0x44] sm:$0x1] }
  0x2b   : > { %376 = vst.msk [vmem:[#allocation2 + $0x3c] sm:$0xf] %vm359_vm1, %v350_v25  ;;  %377 = vst.msk [vmem:[#allocation2 + $0x40] sm:$0xf] %vm359_vm1, %v351_v26  ;;  %v353_v28 = vld [vmem:[%s3050_s8 + $0x48] sm:$0xf] }
  0x2c   : > { %378 = vst.msk [vmem:[#allocation2 + $0x44] sm:$0x1] %vm362_vm2, %v352_v27  ;;  %v354_v29 = vld [vmem:[%s3050_s8 + $0x4c] sm:$0xf]  ;;  %v355_v30 = vld [vmem:[%s3050_s8 + $0x50] sm:$0x1] }
  0x2d   : > { %379 = vst.msk [vmem:[#allocation2 + $0x48] sm:$0xf] %vm359_vm1, %v353_v28  ;;  %380 = vst.msk [vmem:[#allocation2 + $0x4c] sm:$0xf] %vm359_vm1, %v354_v29  ;;  %v356_v31 = vld [vmem:[%s3050_s8 + $0x54] sm:$0xf] }
  0x2e   : > { %381 = vst.msk [vmem:[#allocation2 + $0x50] sm:$0x1] %vm362_vm2, %v355_v30  ;;  %v357_v32 = vld [vmem:[%s3050_s8 + $0x58] sm:$0xf]  ;;  %v358_v33 = vld [vmem:[%s3050_s8 + $0x5c] sm:$0x1]  ;;  %s2092_s8 = sadd.s32 %s2885_s21, %s2334_s30 }
  0x2f   : > { %v3108_v34 = vld [vmem:[#allocation2] sm:$0xf]  ;;  %v3110_v35 = vld [vmem:[#allocation2 + $0x4] sm:$0xf]  ;;  %v3112_v36 = vld [vmem:[#allocation2 + $0x8] sm:$0x1] }
  0x30   : > { %382 = vst.msk [vmem:[#allocation2 + $0x54] sm:$0xf] %vm359_vm1, %v356_v31  ;;  %383 = vst.msk [vmem:[#allocation2 + $0x58] sm:$0xf] %vm359_vm1, %v357_v32  ;;  %v433_v37 = vshrl.u32 %v3108_v34, 16  ;;  %v436_v38 = vshll.u32 %v3108_v34, 16 }
  0x31   : > { %384 = vst.msk [vmem:[#allocation2 + $0x5c] sm:$0x1] %vm362_vm2, %v358_v33  ;;  %v442_v39 = vshll.u32 %v3110_v35, 16  ;;  %v446_v40 = vshrl.u32 %v3110_v35, 16  ;;  %v3121_v41 = vld [vmem:[#allocation2 + $0xc] sm:$0xf] }
  0x32   : > { %v452_v42 = vshll.u32 %v3112_v36, 16  ;;  %v3124_v43 = vld [vmem:[#allocation2 + $0x10] sm:$0xf]  ;;  %v3126_v44 = vld [vmem:[#allocation2 + $0x14] sm:$0x1]  ;;  %v435_v45 = vrot.slane %v433_v37, 4 }
  0x33   : > { %v438_v46 = vrot.slane %v436_v38, 5  ;;  %v444_v47 = vrot.slane %v442_v39, 5  ;;  %v448_v48 = vrot.slane %v446_v40, 4  ;;  %v457_v50 = vshrl.u32 %v3121_v41, 16  ;;  %v3139_v57 = vld [vmem:[#allocation2 + $0x18] sm:$0xf] }
  0x34   : > { %v454_v49 = vrot.slane %v452_v42, 5  ;;  %v460_v51 = vshll.u32 %v3121_v41, 16  ;;  %v466_v52 = vshll.u32 %v3124_v43, 16  ;;  %v470_v55 = vshrl.u32 %v3124_v43, 16  ;;  %v3147_v62 = vld [vmem:[#allocation2 + $0x1c] sm:$0xf] }
  0x35   : > { %v439_v53 = vor.u32 %v438_v46, %v435_v45  ;;  %v449_v54 = vor.u32 %v448_v48, %v444_v47  ;;  %v476_v56 = vshll.u32 %v3126_v44, 16  ;;  %v459_v59 = vrot.slane %v457_v50, 4  ;;  %v3154_v11 = vld [vmem:[#allocation2 + $0x20] sm:$0x1]  ;;  %v3163_v22 = vld [vmem:[#allocation2 + $0x24] sm:$0xf] }
  0x36   : > { %v462_v60 = vrot.slane %v460_v51, 5  ;;  %v468_v61 = vrot.slane %v466_v52, 5  ;;  %v472_v3 = vrot.slane %v470_v55, 4  ;;  %v963_v10 = vrot.slane %v3126_v44, 5  ;;  %v3171_v27 = vld [vmem:[#allocation2 + $0x28] sm:$0xf] }
  0x37   : > { %v440_v63 = vrot.slane %v439_v53, 4  ;;  %v450_v1 = vrot.slane %v449_v54, 4  ;;  %v478_v4 = vrot.slane %v476_v56, 5  ;;  %v481_v12 = vshrl.u32 %v3139_v57, 16  ;;  %v3178_v32 = vld [vmem:[#allocation2 + $0x2c] sm:$0x1] }
  0x38   : > { %v463_v5 = vor.u32 %v462_v60, %v459_v59  ;;  %v484_v13 = vshll.u32 %v3139_v57, 16  ;;  %v473_v16 = vor.u32 %v472_v3, %v468_v61  ;;  %v490_v17 = vshll.u32 %v3147_v62, 16  ;;  %v3183_v40 = vld [vmem:[#allocation2 + $0x30] sm:$0xf]  ;;  %s2210_s17 = sshll.u32 %s3167_s16, 2  ;;  %s295_s26 = sand.u32 1, %s2877_s19  }
  0x39   : > { %v445_v14 = vsel %vm3143_vm6, %v440_v63, %v444_v47  ;;  %v455_v15 = vsel %vm3143_vm6, %v450_v1, %v454_v49  ;;  %v483_v20 = vrot.slane %v481_v12, 4  ;;  %v494_v25 = vshrl.u32 %v3147_v62, 16  ;;  %v3191_v48 = vld [vmem:[%s3716_s2 + $0x4] sm:$0x3]  ;;  %v3195_v53 = vld [vmem:[#allocation2 + $0x34] sm:$0xf]  ;;  %s3207_s27 = scalar_lea.vmem %s3715_s1, %s2210_s17 }
  0x3a   : > { %v2212_v18 = vcombine.low %v445_v14, %v455_v15  ;;  %v464_v19 = vrot.slane %v463_v5, 4  ;;  %v486_v21 = vrot.slane %v484_v13, 5  ;;  %v474_v23 = vrot.slane %v473_v16, 4  ;;  %v3201_v59 = vld [vmem:[#allocation2 + $0x38] sm:$0x1]  ;;  %s2335_s13 = sshll.u32 %s2092_s8, 7 }
  0x3b   : > { %v492_v24 = vrot.slane %v490_v17, 5  ;;  %v500_v26 = vshll.u32 %v3154_v11, 16  ;;  %v967_v30 = vrot.slane %v3147_v62, 5  ;;  %v970_v31 = vrot.slane %v3154_v11, 5  ;;  %v3215_v15 = vld [vmem:[#allocation2 + $0x40] sm:$0xf]  ;;  %s3663_s10 = scalar_lea.hbm %s3719_s5, %s2335_s13 }
  0x3c   : > { %2430 = vmatprep.mubr.msk.bf16.mxu1 %vm650_vm5, %v2212_v18  ;;  %v469_v28 = vsel %vm3143_vm6, %v464_v19, %v468_v61  ;;  %v487_v29 = vor.u32 %v486_v21, %v483_v20  ;;  %v479_v33 = vsel %vm3143_vm6, %v474_v23, %v478_v4  ;;  %v496_v37 = vrot.slane %v494_v25, 4  ;;  %v3210_v4 = vld [vmem:[#allocation2 + $0x3c] sm:$0xf]  ;;  %v385_v16 = vld [vmem:[%s3207_s27] sm:$0xf]  ;;  %s2081_s14 = scalar_lea.sflag [#allocation4], %s295_s26 }
  0x3d   : > { %v502_v38 = vrot.slane %v500_v26, 5  ;;  %v505_v39 = vshrl.u32 %v3163_v22, 16  ;;  %v2213_v42 = vcombine.low %v469_v28, %v479_v33  ;;  %v508_v46 = vshll.u32 %v3163_v22, 16  ;;  %v386_v20 = vld [vmem:[%s3207_s27 + $0x4] sm:$0xf]  ;;  %s2903_s21 = smov [#allocation3]  }
  0x3e   : > { %v488_v45 = vrot.slane %v487_v29, 4  ;;  %v514_v47 = vshll.u32 %v3171_v27, 16  ;;  %v497_v49 = vor.u32 %v496_v37, %v492_v24  ;;  %v518_v51 = vshrl.u32 %v3171_v27, 16  ;;  %v387_v21 = vld [vmem:[%s3207_s27 + $0x8] sm:$0x1]  ;;  %s2811_s22 = sshll.u32 %s2903_s21, 4  ;;  %s2812_s22 = int_to_ptr.vmem [resolvable:$false] %s2811_s22 }
  0x3f   : > { %v507_v50 = vrot.slane %v505_v39, 4  ;;  %v524_v52 = vshll.u32 %v3178_v32, 16  ;;  %2502 = vmatprep.mubr.msk.bf16.mxu0 %vm650_vm5, %v2213_v42  ;;  %2431 = vmatmul.mubr.msk.bf16.vlgmr.msra.gmra.mrb[0].mxu1 %vm650_vm5, %v2213_v42  ;;  %v510_v55 = vrot.slane %v508_v46, 5  ;;  %v529_v60 = vshrl.u32 %v3183_v40, 16  ;;  %392 = vst.msk [vmem:[#allocation2 + $0x60] sm:$0xf] %vm359_vm1, %v385_v16 }
  0x40   : > { %v493_v54 = vsel %vm3143_vm6, %v488_v45, %v492_v24  ;;  %v516_v56 = vrot.slane %v514_v47, 5  ;;  %v498_v61 = vrot.slane %v497_v49, 4  ;;  %v520_v63 = vrot.slane %v518_v51, 4  ;;  %2447 = vmatpush3.bf16.msra.mxu1 %v3056_v8  ;;  %393 = vst.msk [vmem:[#allocation2 + $0x64] sm:$0xf] %vm359_vm1, %v386_v20 }
  0x41   : > { %v526_v1 = vrot.slane %v524_v52, 5  ;;  %v532_v3 = vshll.u32 %v3183_v40, 16  ;;  %v511_v5 = vor.u32 %v510_v55, %v507_v50  ;;  %v531_v12 = vrot.slane %v529_v60, 4  ;;  %2722 = vmatprep.subr.msk.bf16.mxu1 %vm675_vm0, %v3191_v48  ;;  %394 = vst.msk [vmem:[#allocation2 + $0x68] sm:$0x1] %vm362_vm2, %v387_v21 }
  0x42   : > { %v538_v13 = vshll.u32 %v3195_v53, 16  ;;  %v542_v14 = vshrl.u32 %v3195_v53, 16  ;;  %v503_v17 = vsel %vm3143_vm6, %v498_v61, %v502_v38  ;;  %v521_v18 = vor.u32 %v520_v63, %v516_v56  ;;  %v388_v28 = vld [vmem:[%s3207_s27 + $0xc] sm:$0xf]  ;;  %v389_v42 = vld [vmem:[%s3207_s27 + $0x10] sm:$0xf] }
  0x43   : > { %v534_v19 = vrot.slane %v532_v3, 5  ;;  %v548_v8 = vshll.u32 %v3201_v59, 16  ;;  %v3226_v23 = vcombine.low %v493_v54, %v503_v17  ;;  %v512_v24 = vrot.slane %v511_v5, 4  ;;  %395 = vst.msk [vmem:[#allocation2 + $0x6c] sm:$0xf] %vm359_vm1, %v388_v28 }
  0x44   : > { %v540_v25 = vrot.slane %v538_v13, 5  ;;  %v544_v26 = vrot.slane %v542_v14, 4  ;;  %v522_v29 = vrot.slane %v521_v18, 4  ;;  %v2245_v39 = vrot.slane %v3121_v41, 9  ;;  %396 = vst.msk [vmem:[#allocation2 + $0x70] sm:$0xf] %vm359_vm1, %v389_v42 }
  0x45   : > { %v535_v33 = vor.u32 %v534_v19, %v531_v12  ;;  %v550_v37 = vrot.slane %v548_v8, 5  ;;  %2503 = vmatmul.mubr.msk.bf16.vlgmr.msra.gmra.mrb[0].mxu0 %vm650_vm5, %v3226_v23  ;;  %2434 = vmatprep.mubr.msk.bf16.mxu1 %vm650_vm5, %v3226_v23  ;;  %v517_v45 = vsel %vm3143_vm6, %v512_v24, %v516_v56  ;;  %v960_v47 = vrot.slane %v3124_v43, 5  ;;  %v390_v50 = vld [vmem:[%s3207_s27 + $0x14] sm:$0x1]  ;;  %v3253_v54 = vld [vmem:[#allocation2 + $0x44] sm:$0x1] }
  0x46   : > { %v545_v46 = vor.u32 %v544_v26, %v540_v25  ;;  %v553_v49 = vshrl.u32 %v3210_v4, 16  ;;  %2519 = vmatpush3.bf16.msra.mxu0 %v3053_v7  ;;  %v527_v51 = vsel %vm3143_vm6, %v522_v29, %v526_v1  ;;  %v556_v55 = vshll.u32 %v3210_v4, 16  ;;  %397 = vst.msk [vmem:[#allocation2 + $0x74] sm:$0x1] %vm362_vm2, %v390_v50  ;;  %v3266_v13 = vld [vmem:[#allocation2 + $0x48] sm:$0xf] }
  0x47   : > { %v536_v52 = vrot.slane %v535_v33, 4  ;;  %v562_v56 = vshll.u32 %v3215_v15, 16  ;;  %v3258_v60 = vcombine.low %v517_v45, %v527_v51  ;;  %v961_v63 = vsel %vm3233_vm9, %v2245_v39, %v960_v47  ;;  %2727 = vmatprep.subr.msk.bf16.mxu0 %vm675_vm0, %v3043_v6  ;;  %v3280_v18 = vld [vmem:[#allocation2 + $0x4c] sm:$0xf]  ;;  %v3296_v29 = vld [vmem:[#allocation2 + $0x50] sm:$0x1] }
  0x48   : > { %v546_v61 = vrot.slane %v545_v46, 4  ;;  %v962_v3 = vrot.slane %v960_v47, 4  ;;  %v555_v1 = vrot.slane %v553_v49, 4  ;;  %v558_v5 = vrot.slane %v556_v55, 5  ;;  %v3307_v47 = vld [vmem:[#allocation2 + $0x54] sm:$0xf] }
  0x49   : > { %v541_v7 = vsel %vm3143_vm6, %v536_v52, %v540_v25  ;;  %v564_v12 = vrot.slane %v562_v56, 5  ;;  %2506 = vmatprep.mubr.msk.bf16.mxu0 %vm650_vm5, %v3258_v60  ;;  %2435 = vmatmul.mubr.msk.bf16.gmra.mrb[4].mxu1 %vm650_vm5, %v3258_v60  ;;  %v566_v16 = vshrl.u32 %v3215_v15, 16  ;;  %v572_v17 = vshll.u32 %v3253_v54, 16  ;;  %s2205_s27 = sshll.u32 %s295_s26, 3 }
  0x4a   : > { %v551_v14 = vsel %vm3143_vm6, %v546_v61, %v550_v37  ;;  %v964_v6 = vsel %vm3233_vm9, %v962_v3, %v963_v10  ;;  %v559_v20 = vor.u32 %v558_v5, %v555_v1  ;;  %v2246_v21 = vrot.slane %v3139_v57, 9  ;;  %v3319_v3 = vld [vmem:[#allocation2 + $0x58] sm:$0xf]  ;;  %s297_s9 = scalar_lea.vmem [#allocation3], %s2205_s27  ;;  %s2813_s27 = scalar_lea.vmem %s2812_s22, 256 }
  0x4b   : > { %v3282_v19 = vcombine.low %v541_v7, %v551_v14  ;;  %v3284_v8 = vcombine.low %v961_v63, %v964_v6  ;;  %v568_v24 = vrot.slane %v566_v16, 4  ;;  %v574_v25 = vrot.slane %v572_v17, 5  ;;  %v3324_v14 = vld [vmem:[#allocation2 + $0x5c] sm:$0x1]  ;;  %s2096_s12 = sshll.u32 %s297_s9, 4  ;;  %s3658_s12 = int_to_ptr.vmem [resolvable:$true] %s2096_s12 }
  0x4c   : > { %v969_v44 = vrot.slane %v967_v30, 4  ;;  %v577_v10 = vshrl.u32 %v3266_v13, 16  ;;  %v560_v26 = vrot.slane %v559_v20, 4  ;;  %v968_v28 = vsel %vm3233_vm9, %v2246_v21, %v967_v30  ;;  %s2807_s15 = scalar_lea.vmem %s3658_s12, 128  ;;  %p2814_p5 = scmp.lt.s32.totalorder %s3658_s12, %s2812_s22 }
  0x4d   : > { %2438 = vmatprep.mubr.msk.bf16.mxu1 %vm650_vm5, %v3282_v19  ;;  %v580_v33 = vshll.u32 %v3266_v13, 16  ;;  %v586_v37 = vshll.u32 %v3280_v18, 16  ;;  %2507 = vmatmul.mubr.msk.bf16.gmra.mrb[4].mxu0 %vm650_vm5, %v3282_v19  ;;  %v569_v39 = vor.u32 %v568_v24, %v564_v12  ;;  %v590_v46 = vshrl.u32 %v3280_v18, 16  ;;  %p2808_p1 = scmp.ne.s32.totalorder %s3658_s12, %s2807_s15  ;;  %p2815_p6 = scmp.lt.s32.totalorder %s2813_s27, %s2807_s15 }
  0x4e   : > { %v971_v42 = vsel %vm3233_vm9, %v969_v44, %v970_v31  ;;  %v579_v45 = vrot.slane %v577_v10, 4  ;;  %2520 = vmatprep.mubr.msk.bf16.mxu0 %vm650_vm5, %v3284_v8  ;;  %v565_v30 = vsel %vm3143_vm6, %v560_v26, %v564_v12  ;;  %v596_v55 = vshll.u32 %v3296_v29, 16 }
  0x4f   : > { %v3313_v49 = vcombine.low %v968_v28, %v971_v42  ;;  %v582_v50 = vrot.slane %v580_v33, 5  ;;  %v588_v51 = vrot.slane %v586_v37, 5  ;;  %v570_v52 = vrot.slane %v569_v39, 4  ;;  %v3343_v37 = vld [vmem:[%s3716_s2 + $0xe] sm:$0x3]  ;;  %p2809_p2 = pnand %p2808_p1, %p2985_p3  ;;  %p2816_p7 = por %p2815_p6, %p2814_p5 }
  0x50   : > { %v592_v11 = vrot.slane %v590_v46, 4  ;;  %v2247_v31 = vrot.slane %v3163_v22, 9  ;;  %v974_v61 = vrot.slane %v3171_v27, 5  ;;  %v977_v63 = vrot.slane %v3178_v32, 5 }
  0x51   : > { %v583_v56 = vor.u32 %v582_v50, %v579_v45  ;;  %v601_v7 = vshrl.u32 %v3307_v47, 16  ;;  %v575_v1 = vsel %vm3143_vm6, %v570_v52, %v574_v25  ;;  %v598_v12 = vrot.slane %v596_v55, 5  ;;  %p2810_p4 = pneg %p2809_p2 }
  0x52   : > { %v593_v5 = vor.u32 %v592_v11, %v588_v51  ;;  %v604_v6 = vshll.u32 %v3307_v47, 16  ;;  %v3327_v16 = vcombine.low %v565_v30, %v575_v1  ;;  %v975_v20 = vsel %vm3233_vm9, %v2247_v31, %v974_v61 }
  0x53   : > { %v584_v17 = vrot.slane %v583_v56, 4  ;;  %v976_v32 = vrot.slane %v974_v61, 4  ;;  %v603_v24 = vrot.slane %v601_v7, 4  ;;  %v610_v10 = vshll.u32 %v3319_v3, 16  ;;  %p2817_p9 = pnand %p2816_p7, %p2810_p4 }
  0x54   : > { %v594_v21 = vrot.slane %v593_v5, 4  ;;  %v606_v44 = vrot.slane %v604_v6, 5  ;;  %2439 = vmatmul.mubr.msk.bf16.gmra.mrb[8].mxu1 %vm650_vm5, %v3327_v16  ;;  %v614_v28 = vshrl.u32 %v3319_v3, 16  ;;  %v620_v33 = vshll.u32 %v3324_v14, 16 }
  0x55   : > { %v589_v25 = vsel %vm3143_vm6, %v584_v17, %v588_v51  ;;  %v978_v26 = vsel %vm3233_vm9, %v976_v32, %v977_v63  ;;  %2521 = vmatmul.mubr.msk.bf16.vlgmr.msra.gmra.mrb[0].mxu0 %vm650_vm5, %v3313_v49  ;;  %v612_v46 = vrot.slane %v610_v10, 5  ;;  %v2248_v51 = vrot.slane %v3183_v40, 9 }
  0x56   : > { %v599_v39 = vsel %vm3143_vm6, %v594_v21, %v598_v12  ;;  %v3349_v42 = vcombine.low %v975_v20, %v978_v26  ;;  %v607_v45 = vor.u32 %v606_v44, %v603_v24  ;;  %2537 = vmatpush3.bf16.msra.mxu0 %v3060_v9  ;;  %v616_v50 = vrot.slane %v614_v28, 4  ;;  %v3386_v28 = vld [vmem:[#allocation2 + $0x64] sm:$0xf] }
  0x57   : > { %v3352_v30 = vcombine.low %v589_v25, %v599_v39  ;;  %v981_v11 = vrot.slane %v3195_v53, 5  ;;  %v984_v55 = vrot.slane %v3201_v59, 5  ;;  %v2249_v31 = vrot.slane %v3210_v4, 9  ;;  %2728 = vmatprep.subr.msk.bf16.mxu0 %vm675_vm0, %v3343_v37 }
  0x58   : > { %2524 = vmatprep.mubr.msk.bf16.mxu0 %vm650_vm5, %v3349_v42  ;;  %v608_v52 = vrot.slane %v607_v45, 4  ;;  %v617_v9 = vor.u32 %v616_v50, %v612_v46  ;;  %v622_v56 = vrot.slane %v620_v33, 5  ;;  %v988_v61 = vrot.slane %v3215_v15, 5 }
  0x59   : > { %2442 = vmatprep.mubr.msk.bf16.mxu1 %vm650_vm5, %v3352_v30  ;;  %v991_v63 = vrot.slane %v3253_v54, 5  ;;  %v982_v7 = vsel %vm3233_vm9, %v2248_v51, %v981_v11  ;;  %v983_v1 = vrot.slane %v981_v11, 4  ;;  %v2228_v59 = vcombine.low %v3108_v34, %v3110_v35  ;;  %v3408_v11 = vld [vmem:[#allocation2 + $0x60] sm:$0xf] }
  0x5a   : > { %v995_v5 = vrot.slane %v3280_v18, 5  ;;  %v613_v12 = vsel %vm3143_vm6, %v608_v52, %v612_v46  ;;  %v618_v6 = vrot.slane %v617_v9, 4  ;;  %v989_v17 = vsel %vm3233_vm9, %v2249_v31, %v988_v61 }
  0x5b   : > { %v990_v20 = vrot.slane %v988_v61, 4  ;;  %v985_v54 = vsel %vm3233_vm9, %v983_v1, %v984_v55  ;;  %v2250_v32 = vrot.slane %v3266_v13, 9  ;;  %v998_v24 = vrot.slane %v3296_v29, 5  ;;  %v3410_v55 = vld [vmem:[#allocation2 + $0x68] sm:$0x1] }
  0x5c   : > { %v997_v21 = vrot.slane %v995_v5, 4  ;;  %v623_v44 = vsel %vm3143_vm6, %v618_v6, %v622_v56  ;;  %v3381_v10 = vcombine.low %v982_v7, %v985_v54  ;;  %v2251_v26 = vrot.slane %v3307_v47, 9  ;;  %v2269_v6 = vld [vmem:[%s3716_s2 + $0x6] sm:$0x3] }
  0x5d   : > { %v992_v25 = vsel %vm3233_vm9, %v990_v20, %v991_v63  ;;  %v3388_v33 = vcombine.low %v613_v12, %v623_v44  ;;  %v1002_v45 = vrot.slane %v3319_v3, 5  ;;  %v1005_v29 = vrot.slane %v3324_v14, 5 }
  0x5e   : > { %v3390_v39 = vcombine.low %v989_v17, %v992_v25  ;;  %2525 = vmatmul.mubr.msk.bf16.gmra.mrb[4].mxu0 %vm650_vm5, %v3381_v10  ;;  %v996_v46 = vsel %vm3233_vm9, %v2250_v32, %v995_v5  ;;  %v999_v50 = vsel %vm3233_vm9, %v997_v21, %v998_v24  ;;  %v1450_v52 = vrot.slane %v3386_v28, 5 }
  0x5f   : > { %2443 = vmatmul.mubr.msk.bf16.gmra.mrb[12].mxu1 %vm650_vm5, %v3388_v33  ;;  %v1004_v51 = vrot.slane %v1002_v45, 4  ;;  %v1003_v14 = vsel %vm3233_vm9, %v2251_v26, %v1002_v45  ;;  %v2244_v9 = vrot.slane %v3108_v34, 9  ;;  %v956_v56 = vrot.slane %v3112_v36, 5 }
  0x60   : > { %2528 = vmatprep.mubr.msk.bf16.mxu0 %vm650_vm5, %v3390_v39  ;;  %2448 = vmatprep.mubr.msk.bf16.mxu1 %vm650_vm5, %v2228_v59  ;;  %v3418_v61 = vcombine.low %v3121_v41, %v3124_v43  ;;  %v3420_v63 = vcombine.low %v996_v46, %v999_v50  ;;  %v953_v7 = vrot.slane %v3110_v35, 5  ;;  %v2289_v59 = vrot.slane %v3408_v11, 9 }
  0x61   : > { %v1006_v31 = vsel %vm3233_vm9, %v1004_v51, %v1005_v29  ;;  %v1452_v5 = vrot.slane %v1450_v52, 4  ;;  %v1453_v12 = vrot.slane %v3410_v55, 5  ;;  %v3429_v34 = vcombine.low %v3139_v57, %v3147_v62 }
  0x62   : > { %v3423_v1 = vcombine.low %v1003_v14, %v1006_v31  ;;  %v954_v36 = vsel %vm3233_vm9, %v2244_v9, %v953_v7  ;;  %v955_v41 = vrot.slane %v953_v7, 4  ;;  %v1058_v43 = vsel %vm675_vm0, %v3191_v48, 0  ;;  %v427_v7 = vld [vmem:[#allocation2 + $0x74] sm:$0x1] }
  0x63   : > { %v1451_v57 = vsel %vm3233_vm9, %v2289_v59, %v1450_v52  ;;  %v1454_v62 = vsel %vm3233_vm9, %v1452_v5, %v1453_v12  ;;  %v3457_v20 = vcombine.low %v3163_v22, %v3171_v27  ;;  %v3461_v54 = vcombine.low %v3183_v40, %v3195_v53  ;;  %v2321_v53 = vld [vmem:[%s3716_s2 + $0x10] sm:$0x3] }
  0x64   : > { %v957_v35 = vsel %vm3233_vm9, %v955_v41, %v956_v56  ;;  %v3453_v17 = vcombine.low %v1451_v57, %v1454_v62  ;;  %v3473_v22 = vcombine.low %v3210_v4, %v3215_v15  ;;  %v1738_v27 = vsel %vm675_vm0, %v3343_v37, 0 }
  0x65   : > { %v2253_v48 = vcombine.low %v954_v36, %v957_v35  ;;  %v3479_v40 = vcombine.low %v3266_v13, %v3280_v18  ;;  %v3495_v4 = vcombine.low %v3307_v47, %v3319_v3  ;;  %v3506_v15 = vcombine.low %v3408_v11, %v3386_v28  ;;  %v3515_v18 = vld [vmem:[#allocation2 + $0x6c] sm:$0xf]  ;;  %v3517_v47 = vld [vmem:[#allocation2 + $0x70] sm:$0xf] }
  0x66   : > { %2529 = vmatmul.mubr.msk.bf16.gmra.mrb[8].mxu0 %vm650_vm5, %v3420_v63  ;;  %v1184_v13 = vsel %vm675_vm0, %v2269_v6, 0  ;;  %v2301_v3 = vcombine.low %v3515_v18, %v3517_v47  ;;  %v1303_v37 = vshll.u32 %v3408_v11, 16  ;;  %v1313_v32 = vshrl.u32 %v3386_v28, 16 }
  0x67   : > { %2449 = vmatmul.mubr.msk.bf16.vlgmr.msra.gmra.mrb[0].mxu1 %vm650_vm5, %v3418_v61  ;;  %2532 = vmatprep.mubr.msk.bf16.mxu0 %vm650_vm5, %v3423_v1  ;;  %v1870_v21 = vsel %vm675_vm0, %v2321_v53, 0  ;;  %v1709_v45 = vshll.u32 %v3515_v18, 16  ;;  %v1719_v29 = vshrl.u32 %v3517_v47, 16  ;;  %v1319_v50 = vshll.u32 %v3410_v55, 16 }
  0x68   : > { %2452 = vmatprep.mubr.msk.bf16.mxu1 %vm650_vm5, %v3429_v34  ;;  %2465 = vmatpush3.bf16.msra.mxu1 %v1058_v43  ;;  %v1305_v44 = vrot.slane %v1303_v37, 5  ;;  %v1315_v26 = vrot.slane %v1313_v32, 4  ;;  %v1725_v55 = vshll.u32 %v427_v7, 16  ;;  %v2320_v58 = vrot.slane %v3515_v18, 9 }
  0x69   : > { %2723 = vmatprep.subr.msk.bf16.mxu1 %vm675_vm0, %v2269_v6  ;;  %v1711_v52 = vrot.slane %v1709_v45, 5  ;;  %v1321_v56 = vrot.slane %v1319_v50, 5 }
  0x6a   : > { %v1727_v35 = vrot.slane %v1725_v55, 5 }
  0x6e   : > { %2533 = vmatmul.mubr.msk.bf16.gmra.mrb[12].mxu0 %vm650_vm5, %v3453_v17 }
  0x6f   : > { %2453 = vmatmul.mubr.msk.bf16.gmra.mrb[4].mxu1 %vm650_vm5, %v3457_v20  ;;  %2538 = vmatprep.mubr.msk.bf16.mxu0 %vm650_vm5, %v3429_v34 }
  0x70   : > { %2456 = vmatprep.mubr.msk.bf16.mxu1 %vm650_vm5, %v3461_v54 }
  0x76   : > { %2539 = vmatmul.mubr.msk.bf16.vlgmr.msra.gmra.mrb[0].mxu0 %vm650_vm5, %v3457_v20 }
  0x77   : > { %2457 = vmatmul.mubr.msk.bf16.gmra.mrb[8].mxu1 %vm650_vm5, %v3473_v22  ;;  %2555 = vmatpush3.bf16.msra.mxu0 %v1738_v27 }
  0x78   : > { %2460 = vmatprep.mubr.msk.bf16.mxu1 %vm650_vm5, %v3479_v40  ;;  %2542 = vmatprep.mubr.msk.bf16.mxu0 %vm650_vm5, %v3461_v54 }
  0x79   : > { %2729 = vmatprep.subr.msk.bf16.mxu0 %vm675_vm0, %v2321_v53 }
  0x7e   : > { %2543 = vmatmul.mubr.msk.bf16.gmra.mrb[4].mxu0 %vm650_vm5, %v3473_v22 }
  0x7f   : > { %2461 = vmatmul.mubr.msk.bf16.gmra.mrb[12].mxu1 %vm650_vm5, %v3495_v4  ;;  %2546 = vmatprep.mubr.msk.bf16.mxu0 %vm650_vm5, %v3479_v40 }
  0x80   : > { %2466 = vmatprep.mubr.msk.bf16.mxu1 %vm650_vm5, %v2253_v48 }
  0x86   : > { %2547 = vmatmul.mubr.msk.bf16.gmra.mrb[8].mxu0 %vm650_vm5, %v3495_v4 }
  0x87   : > { %2467 = vmatmul.mubr.msk.bf16.vlgmr.msra.gmra.mrb[0].mxu1 %vm650_vm5, %v3284_v8  ;;  %2550 = vmatprep.mubr.msk.bf16.mxu0 %vm650_vm5, %v3506_v15  ;;  %v1300_v8 = vshrl.u32 %v3408_v11, 16  ;;  %v1721_v11 = vrot.slane %v1719_v29, 4 }
  0x88   : > { %2470 = vmatprep.mubr.msk.bf16.mxu1 %vm650_vm5, %v3313_v49  ;;  %2483 = vmatpush3.bf16.msra.mxu1 %v1184_v13 }
  0x89   : > { %2725 = vmatprep.subr.msk.bf16.mxu1 %vm675_vm0, %v3008_v0  ;;  %v1309_v0 = vshll.u32 %v3386_v28, 16  ;;  %v1302_v24 = vrot.slane %v1300_v8, 4  ;;  %v1715_v28 = vshll.u32 %v3517_v47, 16 }
  0x8b   : > { %v1311_v25 = vrot.slane %v1309_v0, 5  ;;  %v1306_v46 = vor.u32 %v1305_v44, %v1302_v24  ;;  %v1717_v14 = vrot.slane %v1715_v28, 5 }
  0x8d   : > { %v1307_v31 = vrot.slane %v1306_v46, 4  ;;  %v1722_v59 = vor.u32 %v1721_v11, %v1717_v14 }
  0x8e   : > { %2551 = vmatmul.mubr.msk.bf16.gmra.mrb[12].mxu0 %vm650_vm5, %v2301_v3 }
  0x8f   : > { %2471 = vmatmul.mubr.msk.bf16.gmra.mrb[4].mxu1 %vm650_vm5, %v3349_v42  ;;  %2556 = vmatprep.mubr.msk.bf16.mxu0 %vm650_vm5, %v3226_v23  ;;  %v1706_v23 = vshrl.u32 %v3515_v18, 16  ;;  %v1312_v5 = vsel %vm3143_vm6, %v1307_v31, %v1311_v25  ;;  %v1723_v43 = vrot.slane %v1722_v59, 4  ;;  %v3621_v18 = vld [vmem:[%s3718_s4] ss:$0 sm:$0xff] }
  0x90   : > { %2474 = vmatprep.mubr.msk.bf16.mxu1 %vm650_vm5, %v3381_v10 }
  0x91   : > { %v1708_v51 = vrot.slane %v1706_v23, 4  ;;  %v1728_v6 = vsel %vm3143_vm6, %v1723_v43, %v1727_v35 }
  0x96   : > { %2557 = vmatmul.mubr.msk.bf16.vlgmr.msra.gmra.mrb[0].mxu0 %vm650_vm5, %v3258_v60  ;;  %v1316_v60 = vor.u32 %v1315_v26, %v1311_v25 }
  0x97   : > { %2475 = vmatmul.mubr.msk.bf16.gmra.mrb[8].mxu1 %vm650_vm5, %v3390_v39  ;;  %2573 = vmatpush3.bf16.msra.mxu0 %v1870_v21 }
  0x98   : > { %2478 = vmatprep.mubr.msk.bf16.mxu1 %vm650_vm5, %v3420_v63  ;;  %2560 = vmatprep.mubr.msk.bf16.mxu0 %vm650_vm5, %v3282_v19  ;;  %v1317_v9 = vrot.slane %v1316_v60, 4  ;;  %v1712_v19 = vor.u32 %v1711_v52, %v1708_v51 }
  0x9a   : > { %v1322_v12 = vsel %vm3143_vm6, %v1317_v9, %v1321_v56  ;;  %v1713_v41 = vrot.slane %v1712_v19, 4 }
  0x9b   : > { %v2280_v36 = vcombine.low %v1312_v5, %v1322_v12 }
  0x9e   : > { %2561 = vmatmul.mubr.msk.bf16.gmra.mrb[4].mxu0 %vm650_vm5, %v3327_v16 }
  0x9f   : > { %2479 = vmatmul.mubr.msk.bf16.gmra.mrb[12].mxu1 %vm650_vm5, %v3423_v1  ;;  %2564 = vmatprep.mubr.msk.bf16.mxu0 %vm650_vm5, %v3352_v30 }
  0xa0   : > { %2484 = vmatprep.mubr.msk.bf16.mxu1 %vm650_vm5, %v3418_v61  ;;  %v1718_v61 = vsel %vm3143_vm6, %v1713_v41, %v1717_v14 }
  0xa1   : > { %v2311_v57 = vcombine.low %v1718_v61, %v1728_v6 }
  0xa6   : > { %2565 = vmatmul.mubr.msk.bf16.gmra.mrb[8].mxu0 %vm650_vm5, %v3388_v33 }
  0xa7   : > { %2485 = vmatmul.mubr.msk.bf16.vlgmr.msra.gmra.mrb[0].mxu1 %vm650_vm5, %v3429_v34  ;;  %2568 = vmatprep.mubr.msk.bf16.mxu0 %vm650_vm5, %v2280_v36 }
  0xa8   : > { %2488 = vmatprep.mubr.msk.bf16.mxu1 %vm650_vm5, %v3457_v20  ;;  %2591 = vmatpush3.bf16.msra.mxu1 %v3021_v2  ;;  %v1856_v2 = vrot.slane %v3517_v47, 5 }
  0xae   : > { %2569 = vmatmul.mubr.msk.bf16.gmra.mrb[12].mxu0 %vm650_vm5, %v2311_v57 }
  0xaf   : > { %2489 = vmatmul.mubr.msk.bf16.gmra.mrb[4].mxu1 %vm650_vm5, %v3461_v54  ;;  %2574 = vmatprep.mubr.msk.bf16.mxu0 %vm650_vm5, %v3313_v49  ;;  %v1858_v49 = vrot.slane %v1856_v2, 4 }
  0xb0   : > { %2492 = vmatprep.mubr.msk.bf16.mxu1 %vm650_vm5, %v3473_v22 }
  0xb6   : > { %2575 = vmatmul.mubr.msk.bf16.vlgmr.msra.gmra.mrb[0].mxu0 %vm650_vm5, %v3349_v42  ;;  %v1859_v42 = vrot.slane %v427_v7, 5 }
  0xb7   : > { %2493 = vmatmul.mubr.msk.bf16.gmra.mrb[8].mxu1 %vm650_vm5, %v3479_v40  ;;  %2578 = vmatprep.mubr.msk.bf16.mxu0 %vm650_vm5, %v3381_v10  ;;  %v1857_v10 = vsel %vm3233_vm9, %v2320_v58, %v1856_v2 }
  0xb8   : > { %2496 = vmatprep.mubr.msk.bf16.mxu1 %vm650_vm5, %v3495_v4 }
  0xbe   : > { %2579 = vmatmul.mubr.msk.bf16.gmra.mrb[4].mxu0 %vm650_vm5, %v3390_v39  ;;  %v1860_v39 = vsel %vm3233_vm9, %v1858_v49, %v1859_v42 }
  0xbf   : > { %2497 = vmatmul.mubr.msk.bf16.gmra.mrb[12].mxu1 %vm650_vm5, %v3506_v15  ;;  %2582 = vmatprep.mubr.msk.bf16.mxu0 %vm650_vm5, %v3420_v63 }
  0xc0   : > { %2510 = vmatprep.mubr.msk.bf16.mxu1 %vm650_vm5, %v3327_v16  ;;  %v2322_v16 = vcombine.low %v1857_v10, %v1860_v39 }
  0xc6   : > { %2583 = vmatmul.mubr.msk.bf16.gmra.mrb[8].mxu0 %vm650_vm5, %v3423_v1 }
  0xc7   : > { %2511 = vmatmul.mubr.msk.bf16.vlgmr.msra.gmra.mrb[8].mxu1 %vm650_vm5, %v3352_v30  ;;  %2586 = vmatprep.mubr.msk.bf16.mxu0 %vm650_vm5, %v3453_v17 }
  0xc8   : > { %2514 = vmatprep.mubr.msk.bf16.mxu1 %vm650_vm5, %v3388_v33  ;;  %v3616_v33 = vld [vmem:[%s3717_s3] ss:$0 sm:$0xff] }
  0xce   : > { %2587 = vmatmul.mubr.msk.bf16.gmra.mrb[12].mxu0 %vm650_vm5, %v2322_v16 }
  0xcf   : > { %2515 = vmatmul.mubr.msk.bf16.gmra.mrb[12].mxu1 %vm650_vm5, %v2280_v36 }
 0x17a   : > { %v2486_v63 = vpop.f32.mrb[0].mxu1 }
 0x17b   : > { %v1220_v1 = vpop.f32.mrb[1].mxu1 }
 0x17c   : > { %v2487_v30 = vpop.f32.mrb[2].mxu1 }
 0x17d   : > { %v1223_v34 = vpop.f32.mrb[3].mxu1 }
 0x182   : > { %v2490_v62 = vpop.f32.mrb[4].mxu1 }
 0x183   : > { %v1236_v48 = vpop.f32.mrb[5].mxu1 }
 0x184   : > { %v2491_v17 = vpop.f32.mrb[6].mxu1 }
 0x185   : > { %v1239_v20 = vpop.f32.mrb[7].mxu1 }
 0x189   : > { %v2576_v54 = vpop.f32.mrb[0].mxu0 }
 0x18a   : > { %v2592_v22 = vadd.f32 %v2576_v54, %v2486_v63  ;;  %v1906_v38 = vpop.f32.mrb[1].mxu0 }
 0x18b   : > { %v2593_v27 = vadd.f32 %v1906_v38, %v1220_v1  ;;  %v2577_v40 = vpop.f32.mrb[2].mxu0 }
 0x18c   : > { %v2594_v53 = vadd.f32 %v2577_v40, %v2487_v30  ;;  %v1909_v4 = vpop.f32.mrb[3].mxu0  ;;  %v1987_v8 = vmax.f32 %v2592_v22, 0.0 }
 0x18d   : > { %v1985_v15 = vmax.f32 %v2593_v27, 0.0  ;;  %v2595_v13 = vadd.f32 %v1909_v4, %v1223_v34 }
 0x18e   : > { %v2010_v45 = vmul.f32 %v3616_v33, %v1987_v8  ;;  %v1988_v29 = vmax.f32 %v2594_v53, 0.0 }
 0x18f   : > { %v1986_v47 = vmax.f32 %v2595_v13, 0.0  ;;  %v2008_v3 = vmul.f32 %v3616_v33, %v1985_v15 }
 0x190   : > { %v2011_v60 = vmul.f32 %v3616_v33, %v1988_v29  ;;  %v2033_v52 = vadd.f32 %v3621_v18, %v2010_v45 }
 0x191   : > { %v2009_v37 = vmul.f32 %v3616_v33, %v1986_v47  ;;  %v2580_v0 = vpop.f32.mrb[4].mxu0  ;;  %v2031_v32 = vadd.f32 %v3621_v18, %v2008_v3 }
 0x192   : > { %v2596_v21 = vadd.f32 %v2580_v0, %v2490_v62  ;;  %v1922_v24 = vpop.f32.mrb[5].mxu0  ;;  %v2034_v41 = vadd.f32 %v3621_v18, %v2011_v60 }
 0x193   : > { %v2597_v44 = vadd.f32 %v1922_v24, %v1236_v48  ;;  %v2581_v25 = vpop.f32.mrb[6].mxu0  ;;  %2047 = vxpose.xlu0.b32.start [1/16] (narrow) %v2031_v32, 8  ;;  %v2032_v46 = vadd.f32 %v3621_v18, %v2009_v37 }
 0x194   : > { %v2598_v26 = vadd.f32 %v2581_v25, %v2491_v17  ;;  %v1925_v23 = vpop.f32.mrb[7].mxu0  ;;  %v1991_v35 = vmax.f32 %v2596_v21, 0.0 }
 0x195   : > { %v2599_v28 = vadd.f32 %v1925_v23, %v1239_v20  ;;  %v1989_v50 = vmax.f32 %v2597_v44, 0.0 }
 0x196   : > { %v2014_v1 = vmul.f32 %v3616_v33, %v1991_v35  ;;  %v1992_v30 = vmax.f32 %v2598_v26, 0.0 }
 0x197   : > { %2048 = vxpose.xlu0.b32.cont [2/16] (narrow) %v2032_v46, 8  ;;  %v2012_v55 = vmul.f32 %v3616_v33, %v1989_v50  ;;  %v1990_v5 = vmax.f32 %v2599_v28, 0.0 }
 0x198   : > { %v2015_v20 = vmul.f32 %v3616_v33, %v1992_v30  ;;  %v2037_v22 = vadd.f32 %v3621_v18, %v2014_v1 }
 0x199   : > { %v2584_v51 = vpop.f32.mrb[8].mxu0  ;;  %v2013_v61 = vmul.f32 %v3616_v33, %v1990_v5  ;;  %v2035_v57 = vadd.f32 %v3621_v18, %v2012_v55 }
 0x19a   : > { %v2512_v14 = vpop.f32.mrb[8].mxu1  ;;  %v1938_v11 = vpop.f32.mrb[9].mxu0  ;;  %v2038_v40 = vadd.f32 %v3621_v18, %v2015_v20 }
 0x19b   : > { %v2600_v31 = vadd.f32 %v2584_v51, %v2512_v14  ;;  %v1400_v9 = vpop.f32.mrb[9].mxu1  ;;  %v2585_v56 = vpop.f32.mrb[10].mxu0  ;;  %2049 = vxpose.xlu0.b32.cont [3/16] (narrow) %v2033_v52, 8  ;;  %v2036_v48 = vadd.f32 %v3621_v18, %v2013_v61 }
 0x19c   : > { %v2601_v7 = vadd.f32 %v1938_v11, %v1400_v9  ;;  %v2513_v19 = vpop.f32.mrb[10].mxu1  ;;  %v1941_v59 = vpop.f32.mrb[11].mxu0 }
 0x19d   : > { %v2602_v12 = vadd.f32 %v2585_v56, %v2513_v19  ;;  %v1403_v36 = vpop.f32.mrb[11].mxu1  ;;  %v1995_v53 = vmax.f32 %v2600_v31, 0.0 }
 0x19e   : > { %v2603_v43 = vadd.f32 %v1941_v59, %v1403_v36  ;;  %v1993_v54 = vmax.f32 %v2601_v7, 0.0 }
 0x19f   : > { %2050 = vxpose.xlu0.b32.cont [4/16] (narrow) %v2034_v41, 8  ;;  %v2018_v13 = vmul.f32 %v3616_v33, %v1995_v53  ;;  %v1996_v47 = vmax.f32 %v2602_v12, 0.0 }
 0x1a0   : > { %v2016_v38 = vmul.f32 %v3616_v33, %v1993_v54  ;;  %v1994_v27 = vmax.f32 %v2603_v43, 0.0 }
 0x1a1   : > { %v2588_v6 = vpop.f32.mrb[12].mxu0  ;;  %v2019_v8 = vmul.f32 %v3616_v33, %v1996_v47  ;;  %v2041_v0 = vadd.f32 %v3621_v18, %v2018_v13 }
 0x1a2   : > { %v2516_v2 = vpop.f32.mrb[12].mxu1  ;;  %v1954_v58 = vpop.f32.mrb[13].mxu0  ;;  %v2017_v4 = vmul.f32 %v3616_v33, %v1994_v27  ;;  %v2039_v15 = vadd.f32 %v3621_v18, %v2016_v38 }
 0x1a3   : > { %v2604_v49 = vadd.f32 %v2588_v6, %v2516_v2  ;;  %v1416_v42 = vpop.f32.mrb[13].mxu1  ;;  %v2589_v10 = vpop.f32.mrb[14].mxu0  ;;  %2051 = vxpose.xlu0.b32.cont [5/16] (narrow) %v2035_v57, 8  ;;  %v2042_v24 = vadd.f32 %v3621_v18, %v2019_v8 }
 0x1a4   : > { %v2605_v39 = vadd.f32 %v1954_v58, %v1416_v42  ;;  %v2517_v16 = vpop.f32.mrb[14].mxu1  ;;  %v1957_v63 = vpop.f32.mrb[15].mxu0  ;;  %v2040_v3 = vadd.f32 %v3621_v18, %v2017_v4 }
 0x1a5   : > { %v2606_v34 = vadd.f32 %v2589_v10, %v2517_v16  ;;  %v1419_v62 = vpop.f32.mrb[15].mxu1  ;;  %v1999_v44 = vmax.f32 %v2604_v49, 0.0 }
 0x1a6   : > { %v2607_v17 = vadd.f32 %v1957_v63, %v1419_v62  ;;  %v1997_v37 = vmax.f32 %v2605_v39, 0.0 }
 0x1a7   : > { %2052 = vxpose.xlu0.b32.cont [6/16] (narrow) %v2036_v48, 8  ;;  %v2022_v23 = vmul.f32 %v3616_v33, %v1999_v44  ;;  %v2000_v45 = vmax.f32 %v2606_v34, 0.0 }
 0x1a8   : > { %v2020_v32 = vmul.f32 %v3616_v33, %v1997_v37  ;;  %v1998_v21 = vmax.f32 %v2607_v17, 0.0 }
 0x1a9   : > { %v2023_v28 = vmul.f32 %v3616_v33, %v2000_v45  ;;  %v2045_v46 = vadd.f32 %v3621_v18, %v2022_v23 }
 0x1aa   : > { %v2021_v25 = vmul.f32 %v3616_v33, %v1998_v21  ;;  %v2043_v26 = vadd.f32 %v3621_v18, %v2020_v32 }
 0x1ab   : > { %2053 = vxpose.xlu0.b32.cont [7/16] (narrow) %v2037_v22, 8  ;;  %v2046_v60 = vadd.f32 %v3621_v18, %v2023_v28 }
 0x1ac   : > { %v2044_v29 = vadd.f32 %v3621_v18, %v2021_v25 }
 0x1af   : > { %2054 = vxpose.xlu0.b32.cont [8/16] (narrow) %v2038_v40, 8 }
 0x1b3   : > { %2055 = vxpose.xlu0.b32.cont [9/16] (narrow) %v2039_v15, 8 }
 0x1b7   : > { %2056 = vxpose.xlu0.b32.cont [10/16] (narrow) %v2040_v3, 8 }
 0x1bb   : > { %2057 = vxpose.xlu0.b32.cont [11/16] (narrow) %v2041_v0, 8 }
 0x1bf   : > { %2058 = vxpose.xlu0.b32.cont [12/16] (narrow) %v2042_v24, 8 }
 0x1c3   : > { %2059 = vxpose.xlu0.b32.cont [13/16] (narrow) %v2043_v26, 8 }
 0x1c7   : > { %2060 = vxpose.xlu0.b32.cont [14/16] (narrow) %v2044_v29, 8 }
 0x1cb   : > { %2061 = vxpose.xlu0.b32.cont [15/16] (narrow) %v2045_v46, 8 }
 0x1cf   : > { %2062 = vxpose.xlu0.b32.end [16/16] (narrow) %v2046_v60, 8 }
 0x213   : > { %v2063_v33 = vpop.trf.xlu0 }
 0x214   : > { %2079 = vst [vmem:[%s297_s9] sm:$0xff] %v2063_v33 }
 0x215   : > { %2820 = shalt.err (!%p2817_p9)
}
 0x216   : > { %s2821_s26 = scalar_lea.hbm %s3663_s10, 128  ;;  %s2825_s9 = scalar_lea.hbm %s3719_s5, 512 }
 0x217   : > { %p2822_p10 = scmp.ne.s32.totalorder %s3663_s10, %s2821_s26  ;;  %p2826_p13 = scmp.lt.u32.totalorder %s3663_s10, %s3719_s5 }
 0x218   : > { %p2827_p0 = scmp.lt.u32.totalorder %s2825_s9, %s2821_s26  ;;  %p2829_p2 = scmp.lt.u32.totalorder %s2821_s26, %s3663_s10 }
 0x219   : > { %p2823_p11 = pnand %p2822_p10, %p2985_p3 }
 0x21a   : > { %p2828_p1 = por %p2827_p0, %p2826_p13 }
 0x21b   : > { %p2824_p12 = pneg %p2823_p11 }
 0x21c   : > { %p2830_p4 = por %p2829_p2, %p2828_p1 }
 0x21e   : > { %p2831_p5 = pnand %p2830_p4, %p2824_p12 }
 0x220   : > { %2834 = shalt.err (!%p2831_p5)
}
 0x221   : > { %2733 = dma.vmem_to_hbm [thread:$0]  (%p2985_p3), %s3658_s12, 128, %s3663_s10, %s2081_s14  }
 0x222 PF: > { %p2739_p6 = scmp.ge.s32.totalorder %s2901_s25, 2  ;;  %s2108_s17 = sand.u32 1, %s2873_s18  }
 0x223   : > { %s2109_s15 = scalar_lea.sflag [#allocation4], %s2108_s17 }
 0x224   : > { %p2736_p7 = pnand %p2739_p6, %p2994_p8 }
 0x226   : > { %2868 = dma.done.wait (!%p2736_p7), %s2109_s15, 128  }
 0x227   : > { %2870 = vsyncadd (!%p2736_p7), %s2109_s15, 4294967168  ;;  %s18_s25 = sadd.s32 1, %s2901_s25   ;;  %s3727_s18 = smov %s2877_s19 }
 0x228   : > { %p15_p9 = scmp.ge.s32.totalorder %s18_s25, 6   ;;  %s3728_s19 = smov %s2881_s20 }
 0x229   : > { %s3729_s20 = smov %s3003_s11  ;;  %s3730_s21 = smov %s2893_s23 }
 0x22a   : > { %s3731_s22 = smov %s2897_s24  ;;  %s3732_s23 = smov %s3735_s28 }
 0x22b   : > { %s3733_s24 = smov %s3739_s29  ;;  %17 = sbr.rel (!%p15_p9) target bundleno = 5 (0x5), region = 87 }
 0x232   :  { %2114 = vsyncpa [#allocation4], 1 }
 0x233   :  { %2116 = vsyncpa [#allocation4 + $0x1], 1 }

</bundles_post_ra>
